<compile_context>
chip_gen: v5e
topology: v5e:2x2
jax: 0.10.0
libtpu: 0.0.40
codegen_flags: <defaults>
</compile_context>

<pallas_src>
import functools

import jax
import jax.numpy as jnp
from jax import lax
from jax.experimental import pallas as pl
from jax.experimental.pallas import tpu as pltpu


def _round_up(a: int, b: int) -> int:
    return (a + b - 1) // b * b


def _choose_tiles(rows: int, cols: int, itemsize: int):
    """Pick (row_tile, lane_tile) for the (rows, cols) mean-reduction."""
    # Lane (reduction) axis: multiple of 128.  Prefer covering the whole
    # spatial extent in one tile (single reduction step, no scratch
    # round-trip); cap it so huge feature maps still tile.
    lane_cap = 16384                       # 64 KiB per row in f32
    tk = min(_round_up(cols, 128), lane_cap)

    # Row axis: sublane-packing multiple for the dtype (8 for 32-bit, 16 for
    # bf16, 32 for 8-bit).  Target ~4 MiB per input tile -> 8 MiB when
    # double-buffered, comfortably inside every chip's scoped VMEM while
    # staying on the flat part of the DMA-efficiency curve.
    sub = max(8, 32 // max(1, itemsize))
    budget = 4 * 1024 * 1024
    tr = max(sub, budget // (tk * itemsize) // sub * sub)
    tr = min(tr, _round_up(rows, sub))
    return tr, tk


def _gap_kernel(x_ref, o_ref, acc_ref, *, inv_count, total_cols, tk, n_k):
    # x_ref: (TR, TK) input tile; o_ref: (TR, 1) output; acc_ref: (TR, 1) f32.
    k = pl.program_id(1)

    # f32 accumulation (cast in-kernel; HBM traffic stays in the input dtype).
    x = x_ref[...].astype(jnp.float32)
    if total_cols % tk != 0:
        # Ragged last lane tile: zero the out-of-range lanes (garbage reads).
        col = k * tk + lax.broadcasted_iota(jnp.int32, x.shape, 1)
        x = jnp.where(col < total_cols, x, 0.0)

    part = jnp.sum(x, axis=-1, keepdims=True)

    if n_k == 1:
        # Whole reduction in one step: write the result directly.
        o_ref[...] = (part * inv_count).astype(o_ref.dtype)
    else:
        @pl.when(k == 0)
        def _():
            acc_ref[...] = jnp.zeros_like(acc_ref)

        acc_ref[...] += part

        @pl.when(k == n_k - 1)
        def _():
            # Multiply by the trace-time constant 1/(H*W) instead of dividing.
            o_ref[...] = (acc_ref[...] * inv_count).astype(o_ref.dtype)


@jax.jit
def feature_maps_averager(x):
    """AdaptiveAvgPool2d(1) + flatten(1): NCHW (B, C, H, W) -> (B, C)."""
    B, C, H, W = x.shape
    rows, cols = B * C, H * W
    x2 = x.reshape(rows, cols)             # free: contiguous row-major view

    tr, tk = _choose_tiles(rows, cols, x.dtype.itemsize)
    n_r = pl.cdiv(rows, tr)
    n_k = pl.cdiv(cols, tk)

    kernel = functools.partial(
        _gap_kernel,
        inv_count=1.0 / float(cols),
        total_cols=cols,
        tk=tk,
        n_k=n_k,
    )

    out = pl.pallas_call(
        kernel,
        out_shape=jax.ShapeDtypeStruct((rows, 1), x.dtype),
        grid_spec=pltpu.PrefetchScalarGridSpec(
            num_scalar_prefetch=0,
            grid=(n_r, n_k),
            in_specs=[pl.BlockSpec((tr, tk), lambda r, k: (r, k))],
            out_specs=pl.BlockSpec((tr, 1), lambda r, k: (r, 0)),
            scratch_shapes=[pltpu.VMEM((tr, 1), jnp.float32)],
        ),
        compiler_params=pltpu.CompilerParams(
            # Row axis independent (megacore-shardable); reduction axis last.
            dimension_semantics=("parallel", "arbitrary"),
        ),
    )(x2)

    return out.reshape(B, C)


if __name__ == "__main__":
    key = jax.random.PRNGKey(0)
    x = jax.random.normal(key, (2, 4, 16, 16), dtype=jnp.float32)

    y = feature_maps_averager(x)
    jax.block_until_ready(y)

    # Correctness check against a plain-JAX reference of the PyTorch forward.
    y_ref = jnp.mean(x, axis=(2, 3))
    assert y.shape == (2, 4)
    assert jnp.allclose(y, y_ref, atol=1e-5, rtol=1e-5)

    print("KERNEL_OK")
</pallas_src>

<mosaic_0001>
module attributes {stable_mosaic.version = 11 : i64} {
  func.func @_gap_kernel(%arg0: i32, %arg1: i32, %arg2: memref<8x256xf32, #tpu.memory_space<vmem>>, %arg3: memref<8x1xf32, #tpu.memory_space<vmem>>, %arg4: memref<8x1xf32, #tpu.memory_space<vmem>>) attributes {dimension_semantics = [#tpu.dimension_semantics<parallel>, #tpu.dimension_semantics<arbitrary>], iteration_bounds = array<i64: 1, 1>, scalar_prefetch = 0 : i64, scratch_operands = 1 : i64, tpu.core_type = #tpu.core_type<tc>, window_params = [{transform_indices = @transform_0, window_bounds = array<i64: 8, 256>}, {transform_indices = @transform_1, window_bounds = array<i64: 8, 1>}]} {
    %c0 = arith.constant 0 : index
    %c0_0 = arith.constant 0 : index
    %0 = vector.load %arg2[%c0, %c0_0] : memref<8x256xf32, #tpu.memory_space<vmem>>, vector<8x256xf32>
    %cst = arith.constant dense<0.000000e+00> : vector<8xf32>
    %1 = vector.multi_reduction <add>, %0, %cst [1] : vector<8x256xf32> to vector<8xf32>
    %2 = vector.shape_cast %1 : vector<8xf32> to vector<8x1xf32>
    %cst_1 = arith.constant 3.906250e-03 : f32
    %3 = vector.broadcast %cst_1 : f32 to vector<8x1xf32>
    %4 = arith.mulf %2, %3 : vector<8x1xf32>
    %c0_2 = arith.constant 0 : index
    %c0_3 = arith.constant 0 : index
    %5 = vector.load %arg3[%c0_2, %c0_3] : memref<8x1xf32, #tpu.memory_space<vmem>>, vector<8x1xf32>
    tpu.vector_store %arg3[%c0_2, %c0_3], %4 {strides = array<i32>} : memref<8x1xf32, #tpu.memory_space<vmem>>, vector<8x1xf32>,
    return
  }
  func.func @transform_0(%arg0: i32, %arg1: i32) -> (i32, i32) {
    %c0_i32 = arith.constant 0 : i32
    return %arg0, %arg1 : i32, i32
  }
  func.func @transform_1(%arg0: i32, %arg1: i32) -> (i32, i32) {
    %c0_i32 = arith.constant 0 : i32
    %c0_i32_0 = arith.constant 0 : i32
    return %arg0, %c0_i32 : i32, i32
  }
}

</mosaic_0001>

<bundles_post_ra>
// kernel: feature_maps_averager.1
= control target key start
LH: loop header
LB: loop body
LE: loop exit
PB: predicated region body
PF: predicated region fallthrough
CT: control target
= control target key end

     0   :  { %vm14_vm0 = vcmask 7168   ;;  %s39_s0 = inlined_call_operand.vmem [shape: f32[8,256], index: 0, kind: input, shape index: {}]   ;;  %s40_s1 = inlined_call_operand.vmem [shape: f32[8,1], index: 1, kind: output, shape index: {}]  }
   0x1   :  { %v8_v0 = vld [vmem:[%s39_s0] sm:$0xff]  ;;  %v9_v1 = vld [vmem:[%s39_s0 + $0x8] sm:$0xff] }
   0x2   :  { %v10_v2 = vadd.f32 %v9_v1, %v8_v0 }
   0x4   :  { %11 = vadd.xlane.f32.xlu0 %v10_v2 }
  0x77   :  { %v12_v3 = vpop.xlane.xlu0 %11 }
  0x78   :  { %v13_v4 = vmul.f32 0.00390625, %v12_v3 }
  0x7a   :  { %15 = vst.msk [vmem:[%s40_s1] sm:$0xff] %vm14_vm0, %v13_v4 }

</bundles_post_ra>
